<compile_context>
chip_gen: v7x
topology: tpu7x:2x2x1
jax: 0.10.0
libtpu: 0.0.40
codegen_flags: <defaults>
</compile_context>

<pallas_src>
import functools

import jax
import jax.numpy as jnp
from jax.experimental import pallas as pl
from jax.experimental.pallas import tpu as pltpu


# Grouped-row (8-rows-per-lane-row) tile tunables, in grouped rows.
_TG_MIN = 4096    # = 32768 logical rows -> per-step HBM time >> 0.35 us step overhead
_TG_CAP = 8192    # = 65536 logical rows -> ~14 MiB double-buffered, fits the 32 MiB
                  #   scoped-VMEM limit on every chip incl. v7x (64 MiB physical)
_VMEM_LIMIT_BYTES = 32 * 1024 * 1024  # safe on v5e/v6e/v7x; tiles sized to fit within it


def _round_up(a, b):
    return ((a + b - 1) // b) * b


# ---------------------------------------------------------------------------
# Kernel: lane-dense GEMM with bias over grouped-row tiles:
#   out_g = x_g @ W_blk + b_blk
# x_g:(tg, G*M_bug)  W_blk:(G*M_bug, G*M_met) resident  b_blk:(1, G*M_met) resident
# ---------------------------------------------------------------------------
def _gemm_bias_kernel(x_ref, w_ref, b_ref, out_ref):
    out_ref[...] = (
        jnp.dot(x_ref[...], w_ref[...], preferred_element_type=jnp.float32)
        + b_ref[...]
    ).astype(out_ref.dtype)


@functools.partial(jax.jit, static_argnames=("temp_grouper", "temp_selector"))
def model_forward(x, w, z, alpha, beta, *, temp_grouper=1.0, temp_selector=1.0):
    """Pallas forward: fold params in JAX, then one lane-dense pipelined GEMM."""
    n, m_bug = x.shape
    m_met, k = z.shape
    l = w.shape[1]
    assert alpha.shape == (k, l) and beta.shape == (l + 1, k)
    # The PyTorch reference multiplies beta[1:, :] (L,K) elementwise by
    # alpha_act (K,L): only well-defined (and matching torch) when L == K.
    assert l == k, "forward requires L == K (as in the reference module, L=K=2)"

    f32 = jnp.float32
    x = x.astype(f32)

    # ---- parameter fold (plain JAX; tiny tensors, fused by XLA) -------------
    alpha_act = jax.nn.sigmoid(alpha.astype(f32) / temp_selector)        # (K, L)
    w_act = jax.nn.softmax(w.astype(f32) / temp_grouper, axis=1)         # (M_bug, L)
    z_act = jax.nn.softmax(z.astype(f32) / temp_grouper, axis=1)         # (M_met, K)
    core = beta[1:, :].astype(f32) * alpha_act                           # (L,K)*(K,L), L==K
    w_eff = w_act @ core @ z_act.T                                       # (M_bug, M_met)
    b_eff = beta[0:1, :].astype(f32) @ z_act.T                           # (1, M_met)

    # ---- lane-dense row grouping (contiguous reshapes; no extra HBM bytes) --
    g = 128 // m_bug if (0 < m_bug <= 128 and 128 % m_bug == 0) else 8   # 8 for M_bug=16
    gm_bug, gm_met = g * m_bug, g * m_met

    n_pad = _round_up(n, g)
    if n_pad != n:
        x = jnp.pad(x, ((0, n_pad - n), (0, 0)))       # padded rows sliced off below
    rows_g = n_pad // g
    x_g = x.reshape(rows_g, gm_bug)                    # (N/G, G*M_bug): row-major bitcast

    w_blk = jnp.kron(jnp.eye(g, dtype=f32), w_eff)     # block-diag (G*M_bug, G*M_met)
    b_blk = jnp.tile(b_eff, (1, g))                    # (1, G*M_met)

    out_shape = jax.ShapeDtypeStruct((rows_g, gm_met), f32)

    if rows_g <= _TG_MIN:
        # Single block: skip the grid entirely (no megacore/loop setup to pay for).
        vmem = pl.BlockSpec(memory_space=pltpu.MemorySpace.VMEM)
        out_g = pl.pallas_call(
            _gemm_bias_kernel,
            out_shape=out_shape,
            in_specs=[vmem, vmem, vmem],
            out_specs=vmem,
            compiler_params=pltpu.CompilerParams(vmem_limit_bytes=_VMEM_LIMIT_BYTES),
        )(x_g, w_blk, b_blk)
    else:
        # Aim for ~8 grid steps (keeps both v7x TensorCores fed), bounded by
        # [_TG_MIN, _TG_CAP] so per-step DMA stays large but within VMEM budget.
        tg = min(_TG_CAP, max(_TG_MIN, _round_up(pl.cdiv(rows_g, 8), 8)))
        grid_n = pl.cdiv(rows_g, tg)
        out_g = pl.pallas_call(
            _gemm_bias_kernel,
            out_shape=out_shape,
            grid=(grid_n,),
            in_specs=[
                pl.BlockSpec((tg, gm_bug), lambda i: (i, 0)),      # streamed x tile
                pl.BlockSpec((gm_bug, gm_met), lambda i: (0, 0)),  # resident W_blk
                pl.BlockSpec((1, gm_met), lambda i: (0, 0)),       # resident b_blk
            ],
            out_specs=pl.BlockSpec((tg, gm_met), lambda i: (i, 0)),
            compiler_params=pltpu.CompilerParams(
                dimension_semantics=("parallel",),   # shards grid across 2 TCs on v7x
                vmem_limit_bytes=_VMEM_LIMIT_BYTES),
        )(x_g, w_blk, b_blk)

    out = out_g.reshape(n_pad, m_met)                  # contiguous ungrouping
    if n_pad != n:
        out = out[:n]
    return out


def model_forward_ref(x, w, z, alpha, beta, *, temp_grouper=1.0, temp_selector=1.0):
    """Pure-JAX reference of the PyTorch forward, for validation."""
    alpha_act = jax.nn.sigmoid(alpha / temp_selector)
    w_act = jax.nn.softmax(w / temp_grouper, axis=1)
    z_act = jax.nn.softmax(z / temp_grouper, axis=1)
    g = x @ w_act
    out_clusters = beta[0, :] + g @ (beta[1:, :] * alpha_act)
    return out_clusters @ z_act.T


if __name__ == "__main__":
    # Small, deterministic synthetic setup consistent with the module:
    # L = K = 2, M_bug microbes, M_met metabolites, N samples.
    L, K = 2, 2
    N, M_BUG, M_MET = 8, 16, 12
    beta_var = 10.0
    temp_grouper, temp_selector = 1.0, 1.0

    key = jax.random.PRNGKey(0)
    k_beta, k_alpha, k_w, k_z, k_x, k_x2, k_x3 = jax.random.split(key, 7)

    # beta ~ Normal(0, beta_var)  (beta_var is the std in torch.normal(0, beta_var))
    beta = beta_var * jax.random.normal(k_beta, (L + 1, K), dtype=jnp.float32)
    # alpha ~ Bernoulli(0.5) over (K, L)
    alpha = jax.random.bernoulli(k_alpha, 0.5, (K, L)).astype(jnp.float32)
    # w: one-hot cluster assignments for microbes, (M_bug, L)
    w = jax.nn.one_hot(jax.random.randint(k_w, (M_BUG,), 0, L), L, dtype=jnp.float32)
    # z: one-hot cluster assignments for metabolites, (M_met, K)
    z = jax.nn.one_hot(jax.random.randint(k_z, (M_MET,), 0, K), K, dtype=jnp.float32)

    # --- check 1: small input (single-block path) ---------------------------
    x = jax.random.normal(k_x, (N, M_BUG), dtype=jnp.float32)
    out = jax.block_until_ready(
        model_forward(x, w, z, alpha, beta,
                      temp_grouper=temp_grouper, temp_selector=temp_selector))
    ref = model_forward_ref(x, w, z, alpha, beta,
                            temp_grouper=temp_grouper, temp_selector=temp_selector)
    assert out.shape == (N, M_MET)
    assert jnp.allclose(out, ref, atol=2e-3, rtol=1e-3), "mismatch (small)"

    # --- check 2: N not a multiple of the 8-row grouping (pad + slice path) --
    N_MID = 1003
    x_mid = jax.random.normal(k_x3, (N_MID, M_BUG), dtype=jnp.float32)
    out_mid = jax.block_until_ready(
        model_forward(x_mid, w, z, alpha, beta,
                      temp_grouper=temp_grouper, temp_selector=temp_selector))
    ref_mid = model_forward_ref(x_mid, w, z, alpha, beta,
                                temp_grouper=temp_grouper, temp_selector=temp_selector)
    assert out_mid.shape == (N_MID, M_MET)
    assert jnp.allclose(out_mid, ref_mid, atol=2e-3, rtol=1e-3), "mismatch (uneven N)"

    # --- check 3: large input exercising the multi-tile pipelined grid path --
    N_BIG = 524288   # -> 65536 grouped rows, 8 grid steps of 8192 grouped rows
    x_big = jax.random.normal(k_x2, (N_BIG, M_BUG), dtype=jnp.float32)
    out_big = jax.block_until_ready(
        model_forward(x_big, w, z, alpha, beta,
                      temp_grouper=temp_grouper, temp_selector=temp_selector))
    ref_big = model_forward_ref(x_big, w, z, alpha, beta,
                                temp_grouper=temp_grouper, temp_selector=temp_selector)
    assert out_big.shape == (N_BIG, M_MET)
    assert jnp.allclose(out_big, ref_big, atol=2e-3, rtol=1e-3), "mismatch (tiled)"

    print("KERNEL_OK")
</pallas_src>

<mosaic_0001>
module attributes {stable_mosaic.version = 11 : i64} {
  func.func @_gemm_bias_kernel(%arg0: memref<1x128xf32, #tpu.memory_space<vmem>>, %arg1: memref<128x96xf32, #tpu.memory_space<vmem>>, %arg2: memref<1x96xf32, #tpu.memory_space<vmem>>, %arg3: memref<1x96xf32, #tpu.memory_space<vmem>>) attributes {dimension_semantics = [], scalar_prefetch = 0 : i64, scratch_operands = 0 : i64, tpu.core_type = #tpu.core_type<tc>} {
    %c0 = arith.constant 0 : index
    %c0_0 = arith.constant 0 : index
    %0 = vector.load %arg0[%c0, %c0_0] : memref<1x128xf32, #tpu.memory_space<vmem>>, vector<1x128xf32>
    %c0_1 = arith.constant 0 : index
    %c0_2 = arith.constant 0 : index
    %1 = vector.load %arg1[%c0_1, %c0_2] : memref<128x96xf32, #tpu.memory_space<vmem>>, vector<128x96xf32>
    %cst = arith.constant dense<0.000000e+00> : vector<1x96xf32>
    %2 = tpu.matmul %0, %1, %cst {dimension_numbers = #tpu.dot_dimension_numbers<[1], [0], [0], [1], [0, 0, 1, 1], [], []>} : vector<1x128xf32>, vector<128x96xf32>, vector<1x96xf32> -> vector<1x96xf32>
    %c0_3 = arith.constant 0 : index
    %c0_4 = arith.constant 0 : index
    %3 = vector.load %arg2[%c0_3, %c0_4] : memref<1x96xf32, #tpu.memory_space<vmem>>, vector<1x96xf32>
    %4 = arith.addf %2, %3 : vector<1x96xf32>
    %c0_5 = arith.constant 0 : index
    %c0_6 = arith.constant 0 : index
    %5 = vector.load %arg3[%c0_5, %c0_6] : memref<1x96xf32, #tpu.memory_space<vmem>>, vector<1x96xf32>
    tpu.vector_store %arg3[%c0_5, %c0_6], %4 {strides = array<i32>} : memref<1x96xf32, #tpu.memory_space<vmem>>, vector<1x96xf32>,
    return
  }
}

</mosaic_0001>

<bundles_post_ra>
// kernel: model_forward.1
= control target key start
LH: loop header
LB: loop body
LE: loop exit
PB: predicated region body
PF: predicated region fallthrough
CT: control target
= control target key end

     0   :  { %v187_v0 = vmov 0.0|0.0   ;;  %vm188_vm0 = vmmov 0   ;;  %v189_v4 = vmov 0.0   ;;  %vm102_vm1 = vcmask 778240   ;;  %s267_s1 = inlined_call_operand.vmem [shape: f32[128,96], index: 1, kind: input, shape index: {}]   ;;  %s268_s0 = inlined_call_operand.vmem [shape: f32[1,128], index: 0, kind: input, shape index: {}]   ;;  %s269_s2 = inlined_call_operand.vmem [shape: f32[1,96], index: 2, kind: input, shape index: {}]   ;;  %s270_s3 = inlined_call_operand.vmem [shape: f32[1,96], index: 3, kind: output, shape index: {}]  }
   0x1   :  { %160 = vmatprep.subr.bf16.mxu0 %v187_v0  ;;  %v15_v1 = vld [vmem:[%s267_s1] sm:$0xff]  ;;  %v16_v2 = vld [vmem:[%s267_s1 + $0x8] sm:$0xff]  ;;  %v17_v3 = vld [vmem:[%s267_s1 + $0x10] sm:$0xff]  ;;  %157 = vmatprep.mubr.msk.f32.mxu0 %vm188_vm0, %v189_v4 }
   0x2   :  { %v161_v5 = vpack.c.bf16 %v16_v2, %v15_v1  ;;  %v18_v6 = vld [vmem:[%s267_s1 + $0x18] sm:$0xff]  ;;  %v19_v8 = vld [vmem:[%s267_s1 + $0x20] sm:$0xff]  ;;  %v20_v9 = vld [vmem:[%s267_s1 + $0x28] sm:$0xff] }
   0x3   :  { %v164_v7 = vpack.c.bf16 %v18_v6, %v17_v3  ;;  %v167_v10 = vpack.c.bf16 %v20_v9, %v19_v8  ;;  %v21_v11 = vld [vmem:[%s267_s1 + $0x30] sm:$0xff]  ;;  %v22_v12 = vld [vmem:[%s267_s1 + $0x38] sm:$0xff]  ;;  %v23_v14 = vld [vmem:[%s267_s1 + $0x40] sm:$0xff] }
   0x4   :  { %162 = vmatpush3.bf16.msra.mxu0 %v161_v5  ;;  %v170_v13 = vpack.c.bf16 %v22_v12, %v21_v11  ;;  %v24_v15 = vld [vmem:[%s267_s1 + $0x48] sm:$0xff]  ;;  %v25_v17 = vld [vmem:[%s267_s1 + $0x50] sm:$0xff]  ;;  %v26_v18 = vld [vmem:[%s267_s1 + $0x58] sm:$0xff] }
   0x5   :  { %163 = vmatprep.subr.bf16.mxu0 %v187_v0  ;;  %v173_v16 = vpack.c.bf16 %v24_v15, %v23_v14  ;;  %v176_v19 = vpack.c.bf16 %v26_v18, %v25_v17  ;;  %v27_v20 = vld [vmem:[%s267_s1 + $0x60] sm:$0xff]  ;;  %v28_v21 = vld [vmem:[%s267_s1 + $0x68] sm:$0xff]  ;;  %v29_v23 = vld [vmem:[%s267_s1 + $0x70] sm:$0xff] }
   0x6   :  { %v179_v22 = vpack.c.bf16 %v28_v21, %v27_v20  ;;  %v30_v24 = vld [vmem:[%s267_s1 + $0x78] sm:$0xff]  ;;  %v14_v26 = vld [vmem:[%s268_s0] sm:$0x1] }
   0x7   :  { %v182_v25 = vpack.c.bf16 %v30_v24, %v29_v23  ;;  %v31_v27 = vld [vmem:[%s269_s2] sm:$0x1] }
   0x8   :  { %165 = vmatpush3.bf16.msra.mxu0 %v164_v7 }
   0x9   :  { %166 = vmatprep.subr.bf16.mxu0 %v187_v0 }
   0xc   :  { %168 = vmatpush3.bf16.msra.mxu0 %v167_v10 }
   0xd   :  { %169 = vmatprep.subr.bf16.mxu0 %v187_v0 }
  0x10   :  { %171 = vmatpush3.bf16.msra.mxu0 %v170_v13 }
  0x11   :  { %172 = vmatprep.subr.bf16.mxu0 %v187_v0 }
  0x14   :  { %174 = vmatpush3.bf16.msra.mxu0 %v173_v16 }
  0x15   :  { %175 = vmatprep.subr.bf16.mxu0 %v187_v0 }
  0x18   :  { %177 = vmatpush3.bf16.msra.mxu0 %v176_v19 }
  0x19   :  { %178 = vmatprep.subr.bf16.mxu0 %v187_v0 }
  0x1c   :  { %180 = vmatpush3.bf16.msra.mxu0 %v179_v22 }
  0x1d   :  { %181 = vmatprep.subr.bf16.mxu0 %v187_v0 }
  0x20   :  { %183 = vmatpush3.bf16.msra.mxu0 %v182_v25 }
  0x23   :  { %158 = vmatmul.mubr.f32.vlgmr.msra.gmra.mrb[0].mxu0 %v14_v26 }
  0xf6   :  { %v98_v28 = vpop.f32.mrb[0].mxu0 }
  0xf7   :  { %v99_v29 = vadd.f32 %v98_v28, %v31_v27  ;;  %v159_v30 = vpop.f32.mrb[1].mxu0 }
  0xf9   :  { %103 = vst.msk [vmem:[%s270_s3] sm:$0x1] %vm102_vm1, %v99_v29 }

</bundles_post_ra>
